<compile_context>
chip_gen: v7x
topology: tpu7x:2x2x1
jax: 0.10.0
libtpu: 0.0.40
codegen_flags: <defaults>
</compile_context>

<pallas_src>
import functools

import jax
import jax.numpy as jnp
from jax.experimental import pallas as pl
from jax.experimental.pallas import tpu as pltpu


# ---------------------------------------------------------------------------
# Pallas kernel: fused dual-head chain on one (C_in, TM) pixel tile.
#   x block : (C_in, TM)          bf16   (pixels on lanes)
#   weights : (c_out_l, c_in_l)   bf16   (BN already folded in)
#   biases  : (c_out_l, 1)        f32
#   output  : (C_out_total, TM)   f32    (bbox rows then class rows)
# ---------------------------------------------------------------------------
def _fused_head_kernel(x_ref, w1_ref, w2_ref, b2_ref, w3_ref, b3_ref,
                       w4_ref, b4_ref, out_ref):
    cdt = w1_ref.dtype

    x = x_ref[...]                                                    # (C, TM)

    h = jnp.dot(w1_ref[...], x, preferred_element_type=jnp.float32)
    h = jnp.maximum(h, 0.0)

    h = jnp.dot(w2_ref[...], h.astype(cdt),
                preferred_element_type=jnp.float32) + b2_ref[...]
    h = jnp.maximum(h, 0.0)

    h = jnp.dot(w3_ref[...], h.astype(cdt),
                preferred_element_type=jnp.float32) + b3_ref[...]
    h = jnp.maximum(h, 0.0)

    y = jnp.dot(w4_ref[...], h.astype(cdt),
                preferred_element_type=jnp.float32) + b4_ref[...]
    out_ref[...] = jax.nn.sigmoid(y).astype(out_ref.dtype)


def _round_up(x, m):
    return ((x + m - 1) // m) * m


def _run_fused_head(x_ncp, fused_params, *, tm):
    """x_ncp: (N, C, P) with P a multiple of tm. Returns (N, C_out, P) f32."""
    w1, w2, b2, w3, b3, w4, b4 = fused_params
    N, C, P = x_ncp.shape
    c_out = w4.shape[0]

    grid = (N, P // tm)
    const = lambda n, p: (0, 0)

    in_specs = [
        pl.BlockSpec((None, C, tm), lambda n, p: (n, 0, p)),   # pixel tile
        pl.BlockSpec(w1.shape, const),
        pl.BlockSpec(w2.shape, const),
        pl.BlockSpec(b2.shape, const),
        pl.BlockSpec(w3.shape, const),
        pl.BlockSpec(b3.shape, const),
        pl.BlockSpec(w4.shape, const),
        pl.BlockSpec(b4.shape, const),
    ]
    out_spec = pl.BlockSpec((None, c_out, tm), lambda n, p: (n, 0, p))

    return pl.pallas_call(
        _fused_head_kernel,
        out_shape=jax.ShapeDtypeStruct((N, c_out, P), jnp.float32),
        grid_spec=pl.GridSpec(grid=grid, in_specs=in_specs, out_specs=out_spec),
        compiler_params=pltpu.CompilerParams(
            dimension_semantics=("parallel", "parallel")),
    )(x_ncp, *fused_params)


# ---------------------------------------------------------------------------
# Module wrapper (NCHW in / NCHW out, matching PyTorch forward()).
# ---------------------------------------------------------------------------
def multiple_bbox_head_forward(features_nchw, fused_params, num_box, num_classes,
                               *, tm=1024, compute_dtype=jnp.bfloat16):
    N, C, H, W = features_nchw.shape
    HW = H * W

    tm_eff = min(tm, _round_up(HW, 128))
    P = _round_up(HW, tm_eff)

    x = features_nchw.reshape(N, C, HW).astype(compute_dtype)
    if P != HW:
        x = jnp.pad(x, ((0, 0), (0, 0), (0, P - HW)))

    y = _run_fused_head(x, fused_params, tm=tm_eff)        # (N, C_out, P) f32
    y = y[:, :, :HW].reshape(N, -1, H, W)

    c_bbox = 4 * num_box
    y_bbox = y[:, :c_bbox]
    y_class = y[:, c_bbox:]
    return y_bbox, y_class[:, :-1, :, :], y_class[:, -1, :, :]


# ---------------------------------------------------------------------------
# Parameter construction (deterministic, synthetic) + BN fold + head fusion.
# ---------------------------------------------------------------------------
def _make_raw_head_params(key, num_channels, c_out_final):
    c0 = num_channels
    c1, c2, c3 = c0 // 8, c0 // 4, c0 // 2
    ks = jax.random.split(key, 7)

    def conv_w(k, co, ci):                       # PyTorch 1x1 conv weight (co, ci)
        return 0.2 * jax.random.normal(k, (co, ci), jnp.float32)

    def bn_p(k, c):
        k1, k2, k3, k4 = jax.random.split(k, 4)
        gamma = 1.0 + 0.1 * jax.random.normal(k1, (c,), jnp.float32)
        beta = 0.1 * jax.random.normal(k2, (c,), jnp.float32)
        mean = 0.1 * jax.random.normal(k3, (c,), jnp.float32)
        var = jnp.abs(1.0 + 0.1 * jax.random.normal(k4, (c,), jnp.float32))
        return (gamma, beta, mean, var)

    w1 = conv_w(ks[0], c1, c0); bn1 = bn_p(ks[1], c1)
    w2 = conv_w(ks[2], c2, c1); bn2 = bn_p(ks[3], c2)
    w3 = conv_w(ks[4], c3, c2); bn3 = bn_p(ks[5], c3)
    w4 = conv_w(ks[6], c_out_final, c3)
    return (w1, bn1, w2, bn2, w3, bn3, w4)


def _bn_scale_shift(bn, eps=1e-5):
    gamma, beta, mean, var = bn
    s = gamma / jnp.sqrt(var + eps)
    t = beta - mean * s
    return s, t


def _fold_head(raw):
    """Fold eval-mode BatchNorm into the NEXT conv's weight + bias."""
    w1, bn1, w2, bn2, w3, bn3, w4 = raw
    s1, t1 = _bn_scale_shift(bn1)
    s2, t2 = _bn_scale_shift(bn2)
    s3, t3 = _bn_scale_shift(bn3)
    # W_k @ (s*h + t) = (W_k * s[None, :]) @ h + W_k @ t
    w2f = w2 * s1[None, :]; b2 = (w2 @ t1)[:, None]
    w3f = w3 * s2[None, :]; b3 = (w3 @ t2)[:, None]
    w4f = w4 * s3[None, :]; b4 = (w4 @ t3)[:, None]
    return (w1, w2f, b2, w3f, b3, w4f, b4)


def _fuse_heads(folded_bbox, folded_class, compute_dtype=jnp.bfloat16):
    """Stack the two independent heads into one block-diagonal chain."""
    def blockdiag(a, b):
        out = jnp.zeros((a.shape[0] + b.shape[0], a.shape[1] + b.shape[1]),
                        jnp.float32)
        out = out.at[:a.shape[0], :a.shape[1]].set(a)
        out = out.at[a.shape[0]:, a.shape[1]:].set(b)
        return out

    wb1, wb2, bb2, wb3, bb3, wb4, bb4 = folded_bbox
    wc1, wc2, bc2, wc3, bc3, wc4, bc4 = folded_class

    w1 = jnp.concatenate([wb1, wc1], axis=0)            # shared input features
    w2 = blockdiag(wb2, wc2); b2 = jnp.concatenate([bb2, bc2], axis=0)
    w3 = blockdiag(wb3, wc3); b3 = jnp.concatenate([bb3, bc3], axis=0)
    w4 = blockdiag(wb4, wc4); b4 = jnp.concatenate([bb4, bc4], axis=0)

    cdt = compute_dtype
    return (w1.astype(cdt), w2.astype(cdt), b2.astype(jnp.float32),
            w3.astype(cdt), b3.astype(jnp.float32),
            w4.astype(cdt), b4.astype(jnp.float32))


# ---------------------------------------------------------------------------
# Pure-JAX references for correctness checks.
# ---------------------------------------------------------------------------
def _ref_head_raw_f32(x_nchw, raw):
    """Eval-mode forward in plain f32 JAX, mirroring the PyTorch head exactly."""
    w1, bn1, w2, bn2, w3, bn3, w4 = raw
    N, C, H, W = x_nchw.shape
    h = x_nchw.reshape(N, C, H * W)

    def conv(w, x):
        return jnp.einsum('oi,nip->nop', w, x)

    def bn(x, p, eps=1e-5):
        g, b, m, v = p
        s = g / jnp.sqrt(v + eps)
        t = b - m * s
        return x * s[None, :, None] + t[None, :, None]

    h = bn(jnp.maximum(conv(w1, h), 0.0), bn1)
    h = bn(jnp.maximum(conv(w2, h), 0.0), bn2)
    h = bn(jnp.maximum(conv(w3, h), 0.0), bn3)
    y = jax.nn.sigmoid(conv(w4, h))
    return y.reshape(N, -1, H, W)


def _ref_fused_bf16(x_nchw, fused):
    """Same folded/fused bf16 math as the kernel, in plain JAX."""
    w1, w2, b2, w3, b3, w4, b4 = fused
    N, C, H, W = x_nchw.shape
    x = x_nchw.reshape(N, C, H * W).astype(w1.dtype)

    def mm(w, h):
        return jnp.einsum('oi,nip->nop', w, h.astype(w.dtype),
                          preferred_element_type=jnp.float32)

    h = jnp.maximum(mm(w1, x), 0.0)
    h = jnp.maximum(mm(w2, h) + b2[None], 0.0)
    h = jnp.maximum(mm(w3, h) + b3[None], 0.0)
    y = jax.nn.sigmoid(mm(w4, h) + b4[None])
    return y.reshape(N, -1, H, W)


# ---------------------------------------------------------------------------
if __name__ == "__main__":
    num_channels, num_classes, num_box = 32, 4, 3
    N, H, W = 2, 16, 16                      # 256 pixels per image

    key = jax.random.PRNGKey(0)
    k_x, k_b, k_c = jax.random.split(key, 3)

    features = jax.random.normal(k_x, (N, num_channels, H, W), jnp.float32)

    raw_bbox = _make_raw_head_params(k_b, num_channels, 4 * num_box)
    raw_class = _make_raw_head_params(k_c, num_channels,
                                      num_box * (num_classes + 1))
    fused = _fuse_heads(_fold_head(raw_bbox), _fold_head(raw_class))

    fwd = jax.jit(functools.partial(multiple_bbox_head_forward,
                                    num_box=num_box, num_classes=num_classes))
    y_bbox, y_cls, y_conf = fwd(features, fused)
    jax.block_until_ready((y_bbox, y_cls, y_conf))

    assert y_bbox.shape == (N, 4 * num_box, H, W)
    assert y_cls.shape == (N, num_box * (num_classes + 1) - 1, H, W)
    assert y_conf.shape == (N, H, W)

    c_bbox = 4 * num_box

    # (1) tight check vs pure-JAX doing the *same* folded/fused bf16 math
    #     (differences: accumulation order only).
    ref_fused = _ref_fused_bf16(features, fused)
    assert jnp.allclose(y_bbox, ref_fused[:, :c_bbox], atol=1e-2)
    assert jnp.allclose(y_cls, ref_fused[:, c_bbox:-1], atol=1e-2)
    assert jnp.allclose(y_conf, ref_fused[:, -1], atol=1e-2)

    # (2) semantic check vs full-f32, unfolded, unfused reference mirroring the
    #     PyTorch module (tolerance accounts for bf16 inputs/weights).
    ref_b = _ref_head_raw_f32(features, raw_bbox)
    ref_c = _ref_head_raw_f32(features, raw_class)
    assert jnp.allclose(y_bbox, ref_b, atol=5e-2)
    assert jnp.allclose(y_cls, ref_c[:, :-1], atol=5e-2)
    assert jnp.allclose(y_conf, ref_c[:, -1], atol=5e-2)

    print("KERNEL_OK")
</pallas_src>

<mosaic_0001>
module attributes {stable_mosaic.version = 11 : i64} {
  func.func @_fused_head_kernel(%arg0: i32, %arg1: i32, %arg2: memref<1x32x256xbf16, #tpu.memory_space<vmem>>, %arg3: memref<8x32xbf16, #tpu.memory_space<vmem>>, %arg4: memref<16x8xbf16, #tpu.memory_space<vmem>>, %arg5: memref<16x1xf32, #tpu.memory_space<vmem>>, %arg6: memref<32x16xbf16, #tpu.memory_space<vmem>>, %arg7: memref<32x1xf32, #tpu.memory_space<vmem>>, %arg8: memref<27x32xbf16, #tpu.memory_space<vmem>>, %arg9: memref<27x1xf32, #tpu.memory_space<vmem>>, %arg10: memref<1x27x256xf32, #tpu.memory_space<vmem>>) attributes {dimension_semantics = [#tpu.dimension_semantics<parallel>, #tpu.dimension_semantics<parallel>], iteration_bounds = array<i64: 2, 1>, scalar_prefetch = 0 : i64, scratch_operands = 0 : i64, tpu.core_type = #tpu.core_type<tc>, window_params = [{transform_indices = @transform_0, window_bounds = array<i64: 1, 32, 256>}, {pipeline_mode = #tpu.pipeline_mode<synchronous>, transform_indices = @transform_1, window_bounds = array<i64: 8, 32>}, {pipeline_mode = #tpu.pipeline_mode<synchronous>, transform_indices = @transform_2, window_bounds = array<i64: 16, 8>}, {pipeline_mode = #tpu.pipeline_mode<synchronous>, transform_indices = @transform_3, window_bounds = array<i64: 16, 1>}, {pipeline_mode = #tpu.pipeline_mode<synchronous>, transform_indices = @transform_4, window_bounds = array<i64: 32, 16>}, {pipeline_mode = #tpu.pipeline_mode<synchronous>, transform_indices = @transform_5, window_bounds = array<i64: 32, 1>}, {pipeline_mode = #tpu.pipeline_mode<synchronous>, transform_indices = @transform_6, window_bounds = array<i64: 27, 32>}, {pipeline_mode = #tpu.pipeline_mode<synchronous>, transform_indices = @transform_7, window_bounds = array<i64: 27, 1>}, {transform_indices = @transform_8, window_bounds = array<i64: 1, 27, 256>}]} {
    %c0 = arith.constant 0 : index
    %c0_0 = arith.constant 0 : index
    %c0_1 = arith.constant 0 : index
    %0 = vector.load %arg2[%c0, %c0_0, %c0_1] : memref<1x32x256xbf16, #tpu.memory_space<vmem>>, vector<1x32x256xbf16>
    %1 = vector.shape_cast %0 : vector<1x32x256xbf16> to vector<32x256xbf16>
    %c0_2 = arith.constant 0 : index
    %c0_3 = arith.constant 0 : index
    %2 = vector.load %arg3[%c0_2, %c0_3] : memref<8x32xbf16, #tpu.memory_space<vmem>>, vector<8x32xbf16>
    %cst = arith.constant dense<0.000000e+00> : vector<8x256xf32>
    %3 = tpu.matmul %2, %1, %cst {dimension_numbers = #tpu.dot_dimension_numbers<[1], [0], [0], [1], [0, 0, 1, 1], [], []>} : vector<8x32xbf16>, vector<32x256xbf16>, vector<8x256xf32> -> vector<8x256xf32>
    %cst_4 = arith.constant 0.000000e+00 : f32
    %4 = vector.broadcast %cst_4 : f32 to vector<8x256xf32>
    %5 = arith.maximumf %3, %4 : vector<8x256xf32>
    %c0_5 = arith.constant 0 : index
    %c0_6 = arith.constant 0 : index
    %6 = vector.load %arg4[%c0_5, %c0_6] : memref<16x8xbf16, #tpu.memory_space<vmem>>, vector<16x8xbf16>
    %7 = arith.truncf %5 : vector<8x256xf32> to vector<8x256xbf16>
    %cst_7 = arith.constant dense<0.000000e+00> : vector<16x256xf32>
    %8 = tpu.matmul %6, %7, %cst_7 {dimension_numbers = #tpu.dot_dimension_numbers<[1], [0], [0], [1], [0, 0, 1, 1], [], []>} : vector<16x8xbf16>, vector<8x256xbf16>, vector<16x256xf32> -> vector<16x256xf32>
    %c0_8 = arith.constant 0 : index
    %c0_9 = arith.constant 0 : index
    %9 = vector.load %arg5[%c0_8, %c0_9] : memref<16x1xf32, #tpu.memory_space<vmem>>, vector<16x1xf32>
    %10 = vector.broadcast %9 : vector<16x1xf32> to vector<16x256xf32>
    %11 = arith.addf %8, %10 : vector<16x256xf32>
    %cst_10 = arith.constant 0.000000e+00 : f32
    %12 = vector.broadcast %cst_10 : f32 to vector<16x256xf32>
    %13 = arith.maximumf %11, %12 : vector<16x256xf32>
    %c0_11 = arith.constant 0 : index
    %c0_12 = arith.constant 0 : index
    %14 = vector.load %arg6[%c0_11, %c0_12] : memref<32x16xbf16, #tpu.memory_space<vmem>>, vector<32x16xbf16>
    %15 = arith.truncf %13 : vector<16x256xf32> to vector<16x256xbf16>
    %cst_13 = arith.constant dense<0.000000e+00> : vector<32x256xf32>
    %16 = tpu.matmul %14, %15, %cst_13 {dimension_numbers = #tpu.dot_dimension_numbers<[1], [0], [0], [1], [0, 0, 1, 1], [], []>} : vector<32x16xbf16>, vector<16x256xbf16>, vector<32x256xf32> -> vector<32x256xf32>
    %c0_14 = arith.constant 0 : index
    %c0_15 = arith.constant 0 : index
    %17 = vector.load %arg7[%c0_14, %c0_15] : memref<32x1xf32, #tpu.memory_space<vmem>>, vector<32x1xf32>
    %18 = vector.broadcast %17 : vector<32x1xf32> to vector<32x256xf32>
    %19 = arith.addf %16, %18 : vector<32x256xf32>
    %cst_16 = arith.constant 0.000000e+00 : f32
    %20 = vector.broadcast %cst_16 : f32 to vector<32x256xf32>
    %21 = arith.maximumf %19, %20 : vector<32x256xf32>
    %c0_17 = arith.constant 0 : index
    %c0_18 = arith.constant 0 : index
    %22 = vector.load %arg8[%c0_17, %c0_18] : memref<27x32xbf16, #tpu.memory_space<vmem>>, vector<27x32xbf16>
    %23 = arith.truncf %21 : vector<32x256xf32> to vector<32x256xbf16>
    %cst_19 = arith.constant dense<0.000000e+00> : vector<27x256xf32>
    %24 = tpu.matmul %22, %23, %cst_19 {dimension_numbers = #tpu.dot_dimension_numbers<[1], [0], [0], [1], [0, 0, 1, 1], [], []>} : vector<27x32xbf16>, vector<32x256xbf16>, vector<27x256xf32> -> vector<27x256xf32>
    %c0_20 = arith.constant 0 : index
    %c0_21 = arith.constant 0 : index
    %25 = vector.load %arg9[%c0_20, %c0_21] : memref<27x1xf32, #tpu.memory_space<vmem>>, vector<27x1xf32>
    %26 = vector.broadcast %25 : vector<27x1xf32> to vector<27x256xf32>
    %27 = arith.addf %24, %26 : vector<27x256xf32>
    %28 = arith.negf %27 : vector<27x256xf32>
    %29 = math.exp %28 : vector<27x256xf32>
    %cst_22 = arith.constant 1.000000e+00 : f32
    %30 = vector.broadcast %cst_22 : f32 to vector<27x256xf32>
    %31 = arith.addf %30, %29 : vector<27x256xf32>
    %32 = arith.divf %30, %31 : vector<27x256xf32>
    %c0_23 = arith.constant 0 : index
    %c0_24 = arith.constant 0 : index
    %c0_25 = arith.constant 0 : index
    %33 = vector.load %arg10[%c0_23, %c0_24, %c0_25] : memref<1x27x256xf32, #tpu.memory_space<vmem>>, vector<1x27x256xf32>
    %34 = vector.shape_cast %33 : vector<1x27x256xf32> to vector<27x256xf32>
    %35 = vector.shape_cast %32 : vector<27x256xf32> to vector<1x27x256xf32>
    tpu.vector_store %arg10[%c0_23, %c0_24, %c0_25], %35 {strides = array<i32>} : memref<1x27x256xf32, #tpu.memory_space<vmem>>, vector<1x27x256xf32>,
    return
  }
  func.func @transform_0(%arg0: i32, %arg1: i32) -> (i32, i32, i32) {
    %c0_i32 = arith.constant 0 : i32
    %c0_i32_0 = arith.constant 0 : i32
    return %arg0, %c0_i32, %arg1 : i32, i32, i32
  }
  func.func @transform_1(%arg0: i32, %arg1: i32) -> (i32, i32) {
    %c0_i32 = arith.constant 0 : i32
    %c0_i32_0 = arith.constant 0 : i32
    %c0_i32_1 = arith.constant 0 : i32
    return %c0_i32, %c0_i32_0 : i32, i32
  }
  func.func @transform_2(%arg0: i32, %arg1: i32) -> (i32, i32) {
    %c0_i32 = arith.constant 0 : i32
    %c0_i32_0 = arith.constant 0 : i32
    %c0_i32_1 = arith.constant 0 : i32
    return %c0_i32, %c0_i32_0 : i32, i32
  }
  func.func @transform_3(%arg0: i32, %arg1: i32) -> (i32, i32) {
    %c0_i32 = arith.constant 0 : i32
    %c0_i32_0 = arith.constant 0 : i32
    %c0_i32_1 = arith.constant 0 : i32
    return %c0_i32, %c0_i32_0 : i32, i32
  }
  func.func @transform_4(%arg0: i32, %arg1: i32) -> (i32, i32) {
    %c0_i32 = arith.constant 0 : i32
    %c0_i32_0 = arith.constant 0 : i32
    %c0_i32_1 = arith.constant 0 : i32
    return %c0_i32, %c0_i32_0 : i32, i32
  }
  func.func @transform_5(%arg0: i32, %arg1: i32) -> (i32, i32) {
    %c0_i32 = arith.constant 0 : i32
    %c0_i32_0 = arith.constant 0 : i32
    %c0_i32_1 = arith.constant 0 : i32
    return %c0_i32, %c0_i32_0 : i32, i32
  }
  func.func @transform_6(%arg0: i32, %arg1: i32) -> (i32, i32) {
    %c0_i32 = arith.constant 0 : i32
    %c0_i32_0 = arith.constant 0 : i32
    %c0_i32_1 = arith.constant 0 : i32
    return %c0_i32, %c0_i32_0 : i32, i32
  }
  func.func @transform_7(%arg0: i32, %arg1: i32) -> (i32, i32) {
    %c0_i32 = arith.constant 0 : i32
    %c0_i32_0 = arith.constant 0 : i32
    %c0_i32_1 = arith.constant 0 : i32
    return %c0_i32, %c0_i32_0 : i32, i32
  }
  func.func @transform_8(%arg0: i32, %arg1: i32) -> (i32, i32, i32) {
    %c0_i32 = arith.constant 0 : i32
    %c0_i32_0 = arith.constant 0 : i32
    return %arg0, %c0_i32, %arg1 : i32, i32, i32
  }
}

</mosaic_0001>

<bundles_post_ra>
// kernel: multiple_bbox_head_forward.1
= control target key start
LH: loop header
LB: loop body
LE: loop exit
PB: predicated region body
PF: predicated region fallthrough
CT: control target
= control target key end

     0   :  { %s1026_s27 = smov 0   ;;  %s1028_s28 = smov 0   ;;  %s1122_s0 = inlined_call_operand.vmem [shape: bf16[2,32,256], index: 0, kind: input, shape index: {}]   ;;  %s1123_s1 = inlined_call_operand.vmem [shape: bf16[8,32], index: 1, kind: input, shape index: {}]   ;;  %s1124_s2 = inlined_call_operand.vmem [shape: bf16[16,8], index: 2, kind: input, shape index: {}]   ;;  %s1125_s3 = inlined_call_operand.vmem [shape: f32[16,1], index: 3, kind: input, shape index: {}]   ;;  %s1126_s4 = inlined_call_operand.vmem [shape: bf16[32,16], index: 4, kind: input, shape index: {}]   ;;  %s1127_s5 = inlined_call_operand.vmem [shape: f32[32,1], index: 5, kind: input, shape index: {}]   ;;  %s1128_s6 = inlined_call_operand.vmem [shape: bf16[27,32], index: 6, kind: input, shape index: {}]   ;;  %s1129_s7 = inlined_call_operand.vmem [shape: f32[27,1], index: 7, kind: input, shape index: {}]   ;;  %s1130_s8 = inlined_call_operand.vmem [shape: f32[2,27,256], index: 8, kind: output, shape index: {}]  }
   0x1   :  { %s1030_s29 = smov 0  }
   0x2 LB: > { %s30_s30 = sadd.s32 1, %s974_s28  ;;  %p853_p0 = scmp.ge.s32.totalorder %s978_s29, 1  ;;  %s978_s29 = sphi %s1030_s29, %s18_s29   ;;  %s974_s28 = sphi %s1028_s28, %s1132_s28   ;;  %s970_s27 = sphi %s1026_s27, %s1131_s27  }
   0x3   : > { %p32_p1 = scmp.ge.s32.totalorder %s30_s30, 2  ;;  %p283_p2 = scmp.lt.s32.totalorder %s978_s29, 3 }
   0x5   : > { %s1134_s30 = smov (%p32_p1, %s30_s30), 0  ;;  %p284_p3 = pnand %p853_p0, %p283_p2 }
   0x6   : > { %p326_p4 = scmp.lt.s32.totalorder (!%p284_p3), %s970_s27, 1  ;;  %v980_v0 = vmov (!%p284_p3), 0   ;;  %v350_v5 = vld [vmem:[%s1123_s1] sm:$0xf] (!%p284_p3)  ;;  %vm371_vm0 = vcmask (!%p284_p3), 261120   ;;  %v423_v7 = vld [vmem:[%s1125_s3 + $0x8] sm:$0xff] (!%p284_p3) }
   0x7   : > { %287 = sbr.rel (%p284_p3) target bundleno = 957 (0x3bd), region = 52  ;;  %407 = vmatprep.mubr.bf16.mxu0 (!%p284_p3), %v980_v0  ;;  %482 = vmatprep.mubr.bf16.mxu1 (!%p284_p3), %v980_v0  ;;  %v422_v6 = vld [vmem:[%s1125_s3] sm:$0xff] (!%p284_p3)  ;;  %v505_v8 = vld [vmem:[%s1127_s5 + $0x10] sm:$0xff] (!%p284_p3)  ;;  %vm443_vm1 = vcmask (!%p284_p3), 1043456   ;;  %vm439_vm2 = vcmask (!%p284_p3), 64512   ;;  %v504_v22 = vld [vmem:[%s1127_s5 + $0x8] sm:$0xff] (!%p284_p3) }
   0x8   : > { %911 = vset.pattern.permute.xlu0 (!%p284_p3), %v980_v0  ;;  %912 = vset.pattern.permute.xlu1 (!%p284_p3), %v980_v0  ;;  %v613_v9 = vld [vmem:[%s1129_s7] sm:$0xff] (!%p284_p3)  ;;  %v615_v10 = vld [vmem:[%s1129_s7 + $0x10] sm:$0xff] (!%p284_p3)  ;;  %v506_v23 = vld [vmem:[%s1127_s5 + $0x18] sm:$0xff] (!%p284_p3)  ;;  %vm537_vm3 = vcmask (!%p284_p3), 130048  }
   0x9   : > { %426 = vperm.xlu0 (!%p284_p3), %911, %v422_v6   ;;  %v919_v20 = vld [vmem:[%s1124_s2] sm:$0xff] (!%p284_p3)   ;;  %v614_v24 = vld [vmem:[%s1129_s7 + $0x8] sm:$0xff] (!%p284_p3)  ;;  %v616_v25 = vld [vmem:[%s1129_s7 + $0x18] sm:$0x7] (!%p284_p3) }
   0xa   : > { %v503_v21 = vld [vmem:[%s1127_s5] sm:$0xff] (!%p284_p3)  ;;  %v921_v43 = vld [vmem:[%s1126_s4 + $0x8] sm:$0xff] (!%p284_p3)  }
   0xb   : > { %509 = vperm.xlu1 (!%p284_p3), %912, %v503_v21   ;;  %v920_v42 = vld [vmem:[%s1126_s4] sm:$0xff] (!%p284_p3)  }
   0xd   : > { %431 = vperm.xlu0 (!%p284_p3), %911, %v423_v7  }
   0xe   : > { %s1136_s27 = smov (!%p326_p4, %s970_s27), 1 }
   0xf   : > { %s884_s9 = sshll.u32 %s1136_s27, 5  ;;  %514 = vperm.xlu1 %912, %v504_v22  }
  0x10   : > { %s333_s12 = scalar_lea.vmem %s1122_s0, %s884_s9  ;;  %s885_s9 = sshll.u32 %s1136_s27, 6 }
  0x11   : > { %v913_v1 = vld [vmem:[%s333_s12 + $0x4] ss:$8 sps:$4 sm:$0xff]   ;;  %v915_v2 = vld [vmem:[%s333_s12] ss:$8 sps:$4 sm:$0xff]   ;;  %v916_v3 = vld [vmem:[%s333_s12 + $0x14] ss:$8 sps:$4 sm:$0xff]   ;;  %519 = vperm.xlu0 %911, %v505_v8  }
  0x12   : > { %375 = vmatprep.subr.bf16.mxu0 %v913_v1  ;;  %v918_v4 = vld [vmem:[%s333_s12 + $0x10] ss:$8 sps:$4 sm:$0xff]   ;;  %s343_s12 = scalar_lea.vmem %s1130_s8, %s885_s9 }
  0x13   : > { %376 = vmatpush1.bf16.msra.mxu0 %v915_v2  ;;  %524 = vperm.xlu1 %912, %v506_v23  }
  0x14   : > { %377 = vmatprep.subr.bf16.mxu0 %v916_v3 }
  0x15   : > { %619 = vperm.xlu0 %911, %v613_v9  }
  0x17   : > { %378 = vmatpush1.bf16.msra.mxu0 %v918_v4  ;;  %624 = vperm.xlu1 %912, %v614_v24  }
  0x19   : > { %629 = vperm.xlu0 %911, %v615_v10  }
  0x1a   : > { %862 = vmatmul.mubr.msk.bf16.vlgmr.msra.gmra.mrb[0].mxu0 %vm371_vm0, %v350_v5 }
  0x1b   : > { %685 = vmatprep.mubr.bf16.mxu0 %v980_v0  ;;  %634 = vperm.xlu1 %912, %v616_v25  }
  0x88   : > { %v427_v26 = vpop.permute.xlu0 %426 }
  0x8a   : > { %v510_v44 = vpop.permute.xlu1 %509 }
  0x8c   : > { %v432_v30 = vpop.permute.xlu0 %431 }
  0x8e   : > { %v515_v48 = vpop.permute.xlu1 %514 }
  0x90   : > { %v520_v59 = vpop.permute.xlu0 %519 }
  0x92   : > { %v525_v1 = vpop.permute.xlu1 %524 }
  0xed   : > { %v409_v11 = vpop.f32.mrb[0].mxu0 }
  0xee   : > { %v416_v12 = vmax.f32 %v409_v11, 0.0  ;;  %v411_v13 = vpop.f32.mrb[1].mxu0 }
  0xef   : > { %v417_v14 = vmax.f32 %v411_v13, 0.0  ;;  %v413_v15 = vpop.f32.mrb[2].mxu0  ;;  %v922_v13 = vld [vmem:[%s1128_s6] sm:$0xff]  }
  0xf0   : > { %v420_v16 = vpack.c.bf16 %v416_v12, %v416_v12  ;;  %v414_v17 = vpop.f32.mrb[3].mxu0  ;;  %v620_v15 = vpop.permute.xlu0 %619 }
  0xf1   : > { %v421_v18 = vpack.c.bf16 %v417_v14, %v417_v14  ;;  %v923_v14 = vld [vmem:[%s1128_s6 + $0x8] sm:$0x3f]  }
  0xf2   : > { %v445_v19 = vsel %vm443_vm1, %v420_v16, 0 }
  0xf3   : > { %864 = vmatprep.subr.msk.bf16.mxu1 %vm443_vm1, %v421_v18 }
  0xf4   : > { %451 = vmatpush1.bf16.msra.mxu1 %v445_v19  ;;  %v625_v19 = vpop.permute.xlu1 %624 }
  0xf7   : > { %865 = vmatmul.mubr.msk.bf16.vlgmr.msra.gmra.mrb[0].mxu1 %vm439_vm2, %v919_v20 }
  0xf8   : > { %576 = vmatprep.mubr.bf16.mxu1 %v980_v0 }
 0x1ca   : > { %v484_v27 = vpop.f32.mrb[0].mxu1 }
 0x1cb   : > { %v485_v28 = vadd.f32 %v484_v27, %v427_v26  ;;  %v486_v29 = vpop.f32.mrb[1].mxu1 }
 0x1cc   : > { %v487_v31 = vadd.f32 %v486_v29, %v427_v26  ;;  %v488_v32 = vpop.f32.mrb[2].mxu1 }
 0x1cd   : > { %v489_v33 = vadd.f32 %v488_v32, %v432_v30  ;;  %v490_v34 = vpop.f32.mrb[3].mxu1  ;;  %v493_v36 = vmax.f32 %v485_v28, 0.0  ;;  %v630_v28 = vpop.permute.xlu0 %629 }
 0x1ce   : > { %v491_v35 = vadd.f32 %v490_v34, %v432_v30  ;;  %v494_v38 = vmax.f32 %v487_v31, 0.0  ;;  %v635_v32 = vpop.permute.xlu1 %634 }
 0x1cf   : > { %v495_v37 = vmax.f32 %v489_v33, 0.0 }
 0x1d0   : > { %v496_v39 = vmax.f32 %v491_v35, 0.0 }
 0x1d1   : > { %v501_v40 = vpack.c.bf16 %v495_v37, %v493_v36 }
 0x1d2   : > { %v502_v41 = vpack.c.bf16 %v496_v39, %v494_v38 }
 0x1d4   : > { %544 = vmatprep.subr.bf16.mxu1 %v502_v41 }
 0x1d5   : > { %545 = vmatpush1.bf16.msra.mxu1 %v501_v40 }
 0x1d8   : > { %868 = vmatmul.mubr.msk.bf16.vlgmr.msra.gmra.mrb[4].mxu1 %vm537_vm3, %v920_v42 }
 0x1d9   : > { %586 = vmatprep.mubr.bf16.mxu1 %v980_v0 }
 0x1e0   : > { %869 = vmatmul.mubr.msk.bf16.gmra.mrb[8].mxu1 %vm537_vm3, %v921_v43 }
 0x2ab   : > { %v578_v45 = vpop.f32.mrb[4].mxu1 }
 0x2ac   : > { %v579_v46 = vadd.f32 %v578_v45, %v510_v44  ;;  %v580_v47 = vpop.f32.mrb[5].mxu1 }
 0x2ad   : > { %v581_v49 = vadd.f32 %v580_v47, %v510_v44  ;;  %v582_v50 = vpop.f32.mrb[6].mxu1 }
 0x2ae   : > { %v583_v51 = vadd.f32 %v582_v50, %v515_v48  ;;  %v584_v52 = vpop.f32.mrb[7].mxu1  ;;  %v597_v54 = vmax.f32 %v579_v46, 0.0 }
 0x2af   : > { %v585_v53 = vadd.f32 %v584_v52, %v515_v48  ;;  %v598_v56 = vmax.f32 %v581_v49, 0.0 }
 0x2b0   : > { %v599_v55 = vmax.f32 %v583_v51, 0.0 }
 0x2b1   : > { %v600_v57 = vmax.f32 %v585_v53, 0.0 }
 0x2b2   : > { %v609_v58 = vpack.c.bf16 %v599_v55, %v597_v54 }
 0x2b3   : > { %v610_v60 = vpack.c.bf16 %v600_v57, %v598_v56  ;;  %v588_v61 = vpop.f32.mrb[8].mxu1 }
 0x2b4   : > { %v589_v62 = vadd.f32 %v588_v61, %v520_v59  ;;  %v590_v63 = vpop.f32.mrb[9].mxu1 }
 0x2b5   : > { %v591_v2 = vadd.f32 %v590_v63, %v520_v59  ;;  %v592_v3 = vpop.f32.mrb[10].mxu1  ;;  %653 = vmatprep.subr.bf16.mxu0 %v610_v60 }
 0x2b6   : > { %v593_v4 = vadd.f32 %v592_v3, %v525_v1  ;;  %v594_v5 = vpop.f32.mrb[11].mxu1  ;;  %654 = vmatpush1.bf16.msra.mxu0 %v609_v58  ;;  %v601_v7 = vmax.f32 %v589_v62, 0.0 }
 0x2b7   : > { %v595_v6 = vadd.f32 %v594_v5, %v525_v1  ;;  %v602_v9 = vmax.f32 %v591_v2, 0.0 }
 0x2b8   : > { %v603_v8 = vmax.f32 %v593_v4, 0.0 }
 0x2b9   : > { %v604_v10 = vmax.f32 %v595_v6, 0.0 }
 0x2ba   : > { %v611_v11 = vpack.c.bf16 %v603_v8, %v601_v7 }
 0x2bb   : > { %v612_v12 = vpack.c.bf16 %v604_v10, %v602_v9 }
 0x2bd   : > { %655 = vmatprep.subr.bf16.mxu0 %v612_v12 }
 0x2be   : > { %656 = vmatpush1.bf16.msra.mxu0 %v611_v11 }
 0x2c1   : > { %872 = vmatmul.mubr.msk.bf16.vlgmr.msra.gmra.mrb[4].mxu0 %vm371_vm0, %v922_v13 }
 0x2c2   : > { %695 = vmatprep.mubr.bf16.mxu0 %v980_v0 }
 0x2c9   : > { %873 = vmatmul.mubr.msk.bf16.gmra.mrb[8].mxu0 %vm371_vm0, %v923_v14 }
 0x394   : > { %v687_v16 = vpop.f32.mrb[4].mxu0 }
 0x395   : > { %v688_v17 = vadd.f32 %v687_v16, %v620_v15  ;;  %v689_v18 = vpop.f32.mrb[5].mxu0 }
 0x396   : > { %v690_v20 = vadd.f32 %v689_v18, %v620_v15  ;;  %v691_v21 = vpop.f32.mrb[6].mxu0 }
 0x397   : > { %v874_v22 = vmul.f32 -1.442695, %v688_v17  ;;  %v692_v23 = vadd.f32 %v691_v21, %v625_v19  ;;  %v693_v24 = vpop.f32.mrb[7].mxu0 }
 0x398   : > { %v875_v25 = vmul.f32 -1.442695, %v690_v20  ;;  %v694_v26 = vadd.f32 %v693_v24, %v625_v19 }
 0x399   : > { %924 = vpow2.f32 %v874_v22  ;;  %v876_v0 = vmul.f32 -1.442695, %v692_v23 }
 0x39a   : > { %926 = vpow2.f32 %v875_v25  ;;  %v877_v27 = vmul.f32 -1.442695, %v694_v26 }
 0x39b   : > { %928 = vpow2.f32 %v876_v0 }
 0x39c   : > { %930 = vpow2.f32 %v877_v27  ;;  %v697_v29 = vpop.f32.mrb[8].mxu0 }
 0x39d   : > { %v698_v30 = vadd.f32 %v697_v29, %v630_v28  ;;  %v699_v31 = vpop.f32.mrb[9].mxu0 }
 0x39e   : > { %v700_v33 = vadd.f32 %v699_v31, %v630_v28  ;;  %v701_v34 = vpop.f32.mrb[10].mxu0 }
 0x39f   : > { %v878_v35 = vmul.f32 -1.442695, %v698_v30  ;;  %v702_v36 = vadd.f32 %v701_v34, %v635_v32  ;;  %v703_v37 = vpop.f32.mrb[11].mxu0 }
 0x3a0   : > { %v879_v38 = vmul.f32 -1.442695, %v700_v33  ;;  %v704_v39 = vadd.f32 %v703_v37, %v635_v32 }
 0x3a1   : > { %932 = vpow2.f32 %v878_v35  ;;  %v880_v40 = vmul.f32 -1.442695, %v702_v36 }
 0x3a2   : > { %934 = vpow2.f32 %v879_v38  ;;  %v881_v41 = vmul.f32 -1.442695, %v704_v39 }
 0x3a3   : > { %v925_v42 = vpop.eup %924  ;;  %936 = vpow2.f32 %v880_v40 }
 0x3a4   : > { %v927_v43 = vpop.eup %926  ;;  %v730_v44 = vadd.f32 1.0, %v925_v42  ;;  %938 = vpow2.f32 %v881_v41 }
 0x3a5   : > { %v929_v45 = vpop.eup %928  ;;  %v731_v46 = vadd.f32 1.0, %v927_v43 }
 0x3a6   : > { %v931_v47 = vpop.eup %930  ;;  %940 = vrcp.f32 %v730_v44  ;;  %v732_v48 = vadd.f32 1.0, %v929_v45 }
 0x3a7   : > { %942 = vrcp.f32 %v731_v46  ;;  %v733_v49 = vadd.f32 1.0, %v931_v47 }
 0x3a8   : > { %944 = vrcp.f32 %v732_v48 }
 0x3a9   : > { %946 = vrcp.f32 %v733_v49 }
 0x3ab   : > { %v933_v50 = vpop.eup %932 }
 0x3ac   : > { %v935_v51 = vpop.eup %934  ;;  %v734_v52 = vadd.f32 1.0, %v933_v50 }
 0x3ad   : > { %v937_v53 = vpop.eup %936  ;;  %v735_v54 = vadd.f32 1.0, %v935_v51 }
 0x3ae   : > { %v939_v55 = vpop.eup %938  ;;  %948 = vrcp.f32 %v734_v52  ;;  %v736_v56 = vadd.f32 1.0, %v937_v53 }
 0x3af   : > { %950 = vrcp.f32 %v735_v54  ;;  %v737_v57 = vadd.f32 1.0, %v939_v55 }
 0x3b0   : > { %v941_v58 = vpop.eup %940  ;;  %952 = vrcp.f32 %v736_v56 }
 0x3b1   : > { %v943_v59 = vpop.eup %942  ;;  %754 = vst [vmem:[%s343_s12] sm:$0xff] %v941_v58  ;;  %954 = vrcp.f32 %v737_v57 }
 0x3b2   : > { %v945_v60 = vpop.eup %944  ;;  %755 = vst [vmem:[%s343_s12 + $0x8] sm:$0xff] %v943_v59 }
 0x3b3   : > { %v947_v61 = vpop.eup %946  ;;  %756 = vst [vmem:[%s343_s12 + $0x10] sm:$0xff] %v945_v60 }
 0x3b4   : > { %757 = vst [vmem:[%s343_s12 + $0x18] sm:$0xff] %v947_v61 }
 0x3b8   : > { %v949_v62 = vpop.eup %948 }
 0x3b9   : > { %v951_v63 = vpop.eup %950  ;;  %758 = vst [vmem:[%s343_s12 + $0x20] sm:$0xff] %v949_v62 }
 0x3ba   : > { %v953_v1 = vpop.eup %952  ;;  %759 = vst [vmem:[%s343_s12 + $0x28] sm:$0xff] %v951_v63 }
 0x3bb   : > { %v955_v2 = vpop.eup %954  ;;  %760 = vst [vmem:[%s343_s12 + $0x30] sm:$0x7] %v953_v1 }
 0x3bc   : > { %761 = vst [vmem:[%s343_s12 + $0x38] sm:$0x7] %v955_v2 }
 0x3bd PF: > { %s18_s29 = sadd.s32 1, %s978_s29   ;;  %s1131_s27 = smov %s974_s28 }
 0x3be   : > { %p15_p5 = scmp.ge.s32.totalorder %s18_s29, 4   ;;  %s1132_s28 = smov %s1134_s30 }
 0x3c0   :  { %17 = sbr.rel (!%p15_p5) target bundleno = 2 (0x2), region = 82 }

</bundles_post_ra>
